<compile_context>
chip_gen: v7x
topology: tpu7x:2x2x1
jax: 0.10.0
libtpu: 0.0.40
codegen_flags: <defaults>
</compile_context>

<pallas_src>
import functools
import math

import jax
import jax.numpy as jnp
from jax import lax
from jax.experimental import pallas as pl
from jax.experimental.pallas import tpu as pltpu


def _cdiv(a, b):
    return -(-a // b)


def _round_up(a, b):
    return _cdiv(a, b) * b


def _pad_gate_cols(w, H, H_pad):
    """(..., 4*H) -> (..., 4*H_pad), zero-padding each gate block separately
    so gate k lives in columns [k*H_pad, k*H_pad + H)."""
    lead = w.shape[:-1]
    w4 = w.reshape(*lead, 4, H)
    pad = [(0, 0)] * len(lead) + [(0, 0), (0, H_pad - H)]
    return jnp.pad(w4, pad).reshape(*lead, 4 * H_pad)


def _lstm_chunk_kernel(gx_ref, whh_ref, h0_ref, c0_ref, hn_ref, cn_ref, *,
                       chunk_size, seq_len, hidden_pad, unroll):
    """Runs `chunk_size` LSTM timesteps of the recurrence for one batch tile.

    gx_ref : (Tc, Bt, 4*Hp) f32   precomputed x-path gates (x@W_ih + b)
    whh_ref: (Hp, 4*Hp)     bf16  recurrent weights, gate order [i|f|g|o]
    h0/c0  : (Bt, Hp)       f32   initial state for this batch tile
    hn/cn  : (Bt, Hp)       f32   carried state (resident across the T axis)
    """
    Hp = hidden_pad
    w_dtype = whh_ref.dtype
    t_chunk = pl.program_id(1)

    @pl.when(t_chunk == 0)
    def _():
        hn_ref[...] = h0_ref[...]
        cn_ref[...] = c0_ref[...]

    needs_mask = (seq_len % chunk_size) != 0
    base_t = t_chunk * chunk_size

    def sigmoid(x):
        # One EUP push (tanh) per gate instead of exp + reciprocal.
        return 0.5 * jnp.tanh(0.5 * x) + 0.5

    def step(j, carry):
        h, c = carry
        # Only the h-path matmul is on the serial critical path; cast to bf16
        # right before the dot, accumulate in f32.  Hp>=128 => keep the
        # in-loop W_hh read (holding 4*Hp bf16 columns in vregs would spill).
        gates = gx_ref[j] + jnp.dot(h.astype(w_dtype), whh_ref[...],
                                    preferred_element_type=jnp.float32)
        i_g = sigmoid(gates[:, 0 * Hp:1 * Hp])
        f_g = sigmoid(gates[:, 1 * Hp:2 * Hp])
        g_g = jnp.tanh(gates[:, 2 * Hp:3 * Hp])
        o_g = sigmoid(gates[:, 3 * Hp:4 * Hp])
        c_new = f_g * c + i_g * g_g
        h_new = o_g * jnp.tanh(c_new)
        if needs_mask:  # only generated when T is not a multiple of Tc
            valid = (base_t + j) < seq_len
            h_new = jnp.where(valid, h_new, h)
            c_new = jnp.where(valid, c_new, c)
        return h_new, c_new

    h, c = lax.fori_loop(0, chunk_size, step, (hn_ref[...], cn_ref[...]),
                         unroll=unroll)
    hn_ref[...] = h
    cn_ref[...] = c


def sentiment_lstm_forward(x_tokens, h, params, *, weight_dtype=jnp.bfloat16,
                           chunk_size=16, batch_tile=8, unroll=4):
    """x_tokens: (T, B) int32 ids.  h = (h0, c0), each (1, B, H).
    Returns ((hn, cn), y) like the PyTorch module's forward()."""
    h0, c0 = h
    T, B = x_tokens.shape
    H = params["w_hh"].shape[0]
    E = params["w_ih"].shape[0]

    # --- padded, lane-aligned shapes ---
    H_pad = _round_up(max(H, 128), 128)          # gate slices lane-aligned
    Bt = batch_tile                              # batch tile (>= 8 sublanes)
    B_pad = _round_up(max(B, Bt), Bt)
    Tc = min(chunk_size, T)                      # time-chunk size
    num_t_chunks = _cdiv(T, Tc)
    T_pad = num_t_chunks * Tc
    num_b_tiles = B_pad // Bt

    # --- glue: embedding gather (plain JAX), batch padded with token 0 ---
    x_p = jnp.pad(x_tokens, ((0, 0), (0, B_pad - B)))
    emb_x = jnp.take(params["emb"], x_p, axis=0)                  # (T, Bp, E)

    # --- hoisted x-projection: one dense matmul for all timesteps ---
    w_ih_p = _pad_gate_cols(params["w_ih"], H, H_pad).astype(weight_dtype)
    b_p = _pad_gate_cols(params["b"], H, H_pad)                   # (1, 4Hp)
    gates_x = (jnp.dot(emb_x.astype(weight_dtype).reshape(T * B_pad, E),
                       w_ih_p, preferred_element_type=jnp.float32)
               .reshape(T, B_pad, 4 * H_pad) + b_p)               # f32
    gates_x = jnp.pad(gates_x, ((0, T_pad - T), (0, 0), (0, 0)))

    # --- recurrent weights / initial state, per-gate padded ---
    w_hh_p = _pad_gate_cols(params["w_hh"], H, H_pad)             # (H, 4Hp)
    w_hh_p = jnp.pad(w_hh_p, ((0, H_pad - H), (0, 0))).astype(weight_dtype)
    h0_p = jnp.pad(h0[0], ((0, B_pad - B), (0, H_pad - H)))
    c0_p = jnp.pad(c0[0], ((0, B_pad - B), (0, H_pad - H)))

    # --- VMEM budget: 2x double-buffered chunk + weights + state + headroom ---
    chunk_bytes = Tc * Bt * 4 * H_pad * 4
    weight_bytes = H_pad * 4 * H_pad * jnp.dtype(weight_dtype).itemsize
    state_bytes = Bt * H_pad * 4
    vmem_limit = int(2 * chunk_bytes + 2 * weight_bytes + 8 * state_bytes
                     + (8 << 20))
    vmem_limit = min(vmem_limit, 64 << 20)

    kernel = functools.partial(_lstm_chunk_kernel, chunk_size=Tc, seq_len=T,
                               hidden_pad=H_pad, unroll=min(unroll, Tc))

    hn_p, cn_p = pl.pallas_call(
        kernel,
        out_shape=(jax.ShapeDtypeStruct((B_pad, H_pad), jnp.float32),
                   jax.ShapeDtypeStruct((B_pad, H_pad), jnp.float32)),
        grid_spec=pltpu.PrefetchScalarGridSpec(
            num_scalar_prefetch=0,
            grid=(num_b_tiles, num_t_chunks),
            in_specs=[
                pl.BlockSpec((Tc, Bt, 4 * H_pad), lambda b, t: (t, b, 0)),
                pl.BlockSpec((H_pad, 4 * H_pad), lambda b, t: (0, 0)),
                pl.BlockSpec((Bt, H_pad), lambda b, t: (b, 0)),
                pl.BlockSpec((Bt, H_pad), lambda b, t: (b, 0)),
            ],
            out_specs=(pl.BlockSpec((Bt, H_pad), lambda b, t: (b, 0)),
                       pl.BlockSpec((Bt, H_pad), lambda b, t: (b, 0))),
        ),
        compiler_params=pltpu.CompilerParams(
            dimension_semantics=("parallel", "arbitrary"),
            vmem_limit_bytes=vmem_limit),
    )(gates_x, w_hh_p, h0_p, c0_p)

    hn = hn_p[:B, :H]
    cn = cn_p[:B, :H]

    # --- tiny output projection (O << 128 lanes) in plain JAX ---
    y = hn @ params["w_y"] + params["b_y"][0]                     # (B, O)
    return (hn[None], cn[None]), y


def _reference_forward(x_tokens, h, params, *, weight_dtype=jnp.bfloat16):
    """Pure-JAX reference (lax.scan) mirroring PyTorch nn.LSTM semantics,
    with the same bf16-weight / f32-accumulate quantization as the kernel."""
    h0, c0 = h
    H = params["w_hh"].shape[0]
    emb_x = jnp.take(params["emb"], x_tokens, axis=0)
    w_ih = params["w_ih"].astype(weight_dtype)
    w_hh = params["w_hh"].astype(weight_dtype)

    def step(carry, x_t):
        hp, cp = carry
        gates = (jnp.dot(x_t.astype(weight_dtype), w_ih,
                         preferred_element_type=jnp.float32)
                 + jnp.dot(hp.astype(weight_dtype), w_hh,
                           preferred_element_type=jnp.float32)
                 + params["b"][0])
        i = jax.nn.sigmoid(gates[:, 0 * H:1 * H])
        f = jax.nn.sigmoid(gates[:, 1 * H:2 * H])
        g = jnp.tanh(gates[:, 2 * H:3 * H])
        o = jax.nn.sigmoid(gates[:, 3 * H:4 * H])
        cn = f * cp + i * g
        hn = o * jnp.tanh(cn)
        return (hn, cn), None

    (hn, cn), _ = lax.scan(step, (h0[0], c0[0]), emb_x)
    y = hn @ params["w_y"] + params["b_y"][0]
    return (hn[None], cn[None]), y


def init_params(key, input_size, embed_size, hidden_size, output_size):
    """Deterministic init mimicking PyTorch defaults (shapes are what matter)."""
    ks = jax.random.split(key, 7)
    k_lstm = 1.0 / jnp.sqrt(hidden_size)
    k_lin = 1.0 / jnp.sqrt(hidden_size)
    return {
        # nn.Embedding(input_size, embed_size): N(0, 1)
        "emb": jax.random.normal(ks[0], (input_size, embed_size), jnp.float32),
        # nn.LSTM weight_ih_l0 (4H, E) stored transposed as (E, 4H)
        "w_ih": jax.random.uniform(ks[1], (embed_size, 4 * hidden_size),
                                   jnp.float32, -k_lstm, k_lstm),
        # nn.LSTM weight_hh_l0 (4H, H) stored transposed as (H, 4H)
        "w_hh": jax.random.uniform(ks[2], (hidden_size, 4 * hidden_size),
                                   jnp.float32, -k_lstm, k_lstm),
        # b_ih + b_hh combined
        "b": (jax.random.uniform(ks[3], (1, 4 * hidden_size),
                                 jnp.float32, -k_lstm, k_lstm)
              + jax.random.uniform(ks[4], (1, 4 * hidden_size),
                                   jnp.float32, -k_lstm, k_lstm)),
        # nn.Linear(hidden, output): weight (O, H) stored transposed (H, O)
        "w_y": jax.random.uniform(ks[5], (hidden_size, output_size),
                                  jnp.float32, -k_lin, k_lin),
        "b_y": jax.random.uniform(ks[6], (1, output_size),
                                  jnp.float32, -k_lin, k_lin),
    }


if __name__ == "__main__":
    # Small shapes consistent with the module's forward():
    # x: (seq_len, batch) int token ids, h = (h0, c0) each (n_layers=1, B, H).
    input_size = 50     # vocab
    embed_size = 16
    hidden_size = 32
    output_size = 4
    seq_len = 8
    batch = 2           # padded to 8 internally; use >=128 for real throughput

    key = jax.random.PRNGKey(0)
    k_p, k_x = jax.random.split(key)

    params = init_params(k_p, input_size, embed_size, hidden_size, output_size)
    x = jax.random.randint(k_x, (seq_len, batch), 0, input_size, jnp.int32)
    h0 = jnp.zeros((1, batch, hidden_size), jnp.float32)
    c0 = jnp.zeros((1, batch, hidden_size), jnp.float32)

    # chunk_size=4 -> 2 time-chunks, exercising the pipelined grid + pl.when
    # init/finalize paths even at this tiny demo sequence length.
    (hn, cn), y = sentiment_lstm_forward(x, (h0, c0), params, chunk_size=4)
    jax.block_until_ready((hn, cn, y))

    (hn_r, cn_r), y_r = _reference_forward(x, (h0, c0), params)
    assert jnp.allclose(hn, hn_r, atol=1e-4, rtol=1e-4)
    assert jnp.allclose(cn, cn_r, atol=1e-4, rtol=1e-4)
    assert jnp.allclose(y, y_r, atol=1e-4, rtol=1e-4)

    print("KERNEL_OK")
</pallas_src>

<mosaic_0001>
module attributes {stable_mosaic.version = 11 : i64} {
  func.func @_lstm_chunk_kernel(%arg0: i32, %arg1: i32, %arg2: memref<4x8x512xf32, #tpu.memory_space<vmem>>, %arg3: memref<128x512xbf16, #tpu.memory_space<vmem>>, %arg4: memref<8x128xf32, #tpu.memory_space<vmem>>, %arg5: memref<8x128xf32, #tpu.memory_space<vmem>>, %arg6: memref<8x128xf32, #tpu.memory_space<vmem>>, %arg7: memref<8x128xf32, #tpu.memory_space<vmem>>) attributes {dimension_semantics = [#tpu.dimension_semantics<parallel>, #tpu.dimension_semantics<arbitrary>], iteration_bounds = array<i64: 1, 2>, scalar_prefetch = 0 : i64, scratch_operands = 0 : i64, tpu.core_type = #tpu.core_type<tc>, window_params = [{transform_indices = @transform_0, window_bounds = array<i64: 4, 8, 512>}, {pipeline_mode = #tpu.pipeline_mode<synchronous>, transform_indices = @transform_1, window_bounds = array<i64: 128, 512>}, {transform_indices = @transform_2, window_bounds = array<i64: 8, 128>}, {transform_indices = @transform_3, window_bounds = array<i64: 8, 128>}, {transform_indices = @transform_4, window_bounds = array<i64: 8, 128>}, {transform_indices = @transform_5, window_bounds = array<i64: 8, 128>}]} {
    %c0_i32 = arith.constant 0 : i32
    %0 = arith.cmpi eq, %arg1, %c0_i32 : i32
    %1 = arith.extui %0 : i1 to i32
    %c0_i32_0 = arith.constant 0 : i32
    %2 = arith.cmpi ne, %1, %c0_i32_0 : i32
    scf.if %2 {
      %c0_64 = arith.constant 0 : index
      %c0_65 = arith.constant 0 : index
      %159 = vector.load %arg4[%c0_64, %c0_65] : memref<8x128xf32, #tpu.memory_space<vmem>>, vector<8x128xf32>
      %c0_66 = arith.constant 0 : index
      %c0_67 = arith.constant 0 : index
      %160 = vector.load %arg6[%c0_66, %c0_67] : memref<8x128xf32, #tpu.memory_space<vmem>>, vector<8x128xf32>
      tpu.vector_store %arg6[%c0_66, %c0_67], %159 {strides = array<i32>} : memref<8x128xf32, #tpu.memory_space<vmem>>, vector<8x128xf32>,
      %c0_68 = arith.constant 0 : index
      %c0_69 = arith.constant 0 : index
      %161 = vector.load %arg5[%c0_68, %c0_69] : memref<8x128xf32, #tpu.memory_space<vmem>>, vector<8x128xf32>
      %c0_70 = arith.constant 0 : index
      %c0_71 = arith.constant 0 : index
      %162 = vector.load %arg7[%c0_70, %c0_71] : memref<8x128xf32, #tpu.memory_space<vmem>>, vector<8x128xf32>
      tpu.vector_store %arg7[%c0_70, %c0_71], %161 {strides = array<i32>} : memref<8x128xf32, #tpu.memory_space<vmem>>, vector<8x128xf32>,
    } else {
    }
    %c0 = arith.constant 0 : index
    %c0_1 = arith.constant 0 : index
    %3 = vector.load %arg6[%c0, %c0_1] : memref<8x128xf32, #tpu.memory_space<vmem>>, vector<8x128xf32>
    %c0_2 = arith.constant 0 : index
    %c0_3 = arith.constant 0 : index
    %4 = vector.load %arg7[%c0_2, %c0_3] : memref<8x128xf32, #tpu.memory_space<vmem>>, vector<8x128xf32>
    %c0_i32_4 = arith.constant 0 : i32
    %5 = arith.index_cast %c0_i32_4 : i32 to index
    %c0_5 = arith.constant 0 : index
    %c0_6 = arith.constant 0 : index
    %6 = vector.load %arg2[%5, %c0_5, %c0_6] : memref<4x8x512xf32, #tpu.memory_space<vmem>>, vector<1x8x512xf32>
    %7 = vector.shape_cast %6 : vector<1x8x512xf32> to vector<8x512xf32>
    %8 = arith.truncf %3 : vector<8x128xf32> to vector<8x128xbf16>
    %c0_7 = arith.constant 0 : index
    %c0_8 = arith.constant 0 : index
    %9 = vector.load %arg3[%c0_7, %c0_8] : memref<128x512xbf16, #tpu.memory_space<vmem>>, vector<128x512xbf16>
    %cst = arith.constant dense<0.000000e+00> : vector<8x512xf32>
    %10 = tpu.matmul %8, %9, %cst {dimension_numbers = #tpu.dot_dimension_numbers<[1], [0], [0], [1], [0, 0, 1, 1], [], []>} : vector<8x128xbf16>, vector<128x512xbf16>, vector<8x512xf32> -> vector<8x512xf32>
    %11 = arith.addf %7, %10 : vector<8x512xf32>
    %12 = vector.extract_strided_slice %11 {offsets = [0, 0], sizes = [8, 128], strides = [1, 1]} : vector<8x512xf32> to vector<8x128xf32>
    %cst_9 = arith.constant 5.000000e-01 : f32
    %13 = vector.broadcast %cst_9 : f32 to vector<8x128xf32>
    %14 = arith.mulf %13, %12 : vector<8x128xf32>
    %15 = math.tanh %14 : vector<8x128xf32>
    %cst_10 = arith.constant 5.000000e-01 : f32
    %16 = vector.broadcast %cst_10 : f32 to vector<8x128xf32>
    %17 = arith.mulf %16, %15 : vector<8x128xf32>
    %cst_11 = arith.constant 5.000000e-01 : f32
    %18 = vector.broadcast %cst_11 : f32 to vector<8x128xf32>
    %19 = arith.addf %17, %18 : vector<8x128xf32>
    %20 = vector.extract_strided_slice %11 {offsets = [0, 128], sizes = [8, 128], strides = [1, 1]} : vector<8x512xf32> to vector<8x128xf32>
    %cst_12 = arith.constant 5.000000e-01 : f32
    %21 = vector.broadcast %cst_12 : f32 to vector<8x128xf32>
    %22 = arith.mulf %21, %20 : vector<8x128xf32>
    %23 = math.tanh %22 : vector<8x128xf32>
    %cst_13 = arith.constant 5.000000e-01 : f32
    %24 = vector.broadcast %cst_13 : f32 to vector<8x128xf32>
    %25 = arith.mulf %24, %23 : vector<8x128xf32>
    %cst_14 = arith.constant 5.000000e-01 : f32
    %26 = vector.broadcast %cst_14 : f32 to vector<8x128xf32>
    %27 = arith.addf %25, %26 : vector<8x128xf32>
    %28 = vector.extract_strided_slice %11 {offsets = [0, 256], sizes = [8, 128], strides = [1, 1]} : vector<8x512xf32> to vector<8x128xf32>
    %29 = math.tanh %28 : vector<8x128xf32>
    %30 = vector.extract_strided_slice %11 {offsets = [0, 384], sizes = [8, 128], strides = [1, 1]} : vector<8x512xf32> to vector<8x128xf32>
    %cst_15 = arith.constant 5.000000e-01 : f32
    %31 = vector.broadcast %cst_15 : f32 to vector<8x128xf32>
    %32 = arith.mulf %31, %30 : vector<8x128xf32>
    %33 = math.tanh %32 : vector<8x128xf32>
    %cst_16 = arith.constant 5.000000e-01 : f32
    %34 = vector.broadcast %cst_16 : f32 to vector<8x128xf32>
    %35 = arith.mulf %34, %33 : vector<8x128xf32>
    %cst_17 = arith.constant 5.000000e-01 : f32
    %36 = vector.broadcast %cst_17 : f32 to vector<8x128xf32>
    %37 = arith.addf %35, %36 : vector<8x128xf32>
    %38 = arith.mulf %27, %4 : vector<8x128xf32>
    %39 = arith.mulf %19, %29 : vector<8x128xf32>
    %40 = arith.addf %38, %39 : vector<8x128xf32>
    %41 = math.tanh %40 : vector<8x128xf32>
    %42 = arith.mulf %37, %41 : vector<8x128xf32>
    %c1_i32 = arith.constant 1 : i32
    %43 = arith.index_cast %c1_i32 : i32 to index
    %c0_18 = arith.constant 0 : index
    %c0_19 = arith.constant 0 : index
    %44 = vector.load %arg2[%43, %c0_18, %c0_19] : memref<4x8x512xf32, #tpu.memory_space<vmem>>, vector<1x8x512xf32>
    %45 = vector.shape_cast %44 : vector<1x8x512xf32> to vector<8x512xf32>
    %46 = arith.truncf %42 : vector<8x128xf32> to vector<8x128xbf16>
    %c0_20 = arith.constant 0 : index
    %c0_21 = arith.constant 0 : index
    %47 = vector.load %arg3[%c0_20, %c0_21] : memref<128x512xbf16, #tpu.memory_space<vmem>>, vector<128x512xbf16>
    %cst_22 = arith.constant dense<0.000000e+00> : vector<8x512xf32>
    %48 = tpu.matmul %46, %47, %cst_22 {dimension_numbers = #tpu.dot_dimension_numbers<[1], [0], [0], [1], [0, 0, 1, 1], [], []>} : vector<8x128xbf16>, vector<128x512xbf16>, vector<8x512xf32> -> vector<8x512xf32>
    %49 = arith.addf %45, %48 : vector<8x512xf32>
    %50 = vector.extract_strided_slice %49 {offsets = [0, 0], sizes = [8, 128], strides = [1, 1]} : vector<8x512xf32> to vector<8x128xf32>
    %cst_23 = arith.constant 5.000000e-01 : f32
    %51 = vector.broadcast %cst_23 : f32 to vector<8x128xf32>
    %52 = arith.mulf %51, %50 : vector<8x128xf32>
    %53 = math.tanh %52 : vector<8x128xf32>
    %cst_24 = arith.constant 5.000000e-01 : f32
    %54 = vector.broadcast %cst_24 : f32 to vector<8x128xf32>
    %55 = arith.mulf %54, %53 : vector<8x128xf32>
    %cst_25 = arith.constant 5.000000e-01 : f32
    %56 = vector.broadcast %cst_25 : f32 to vector<8x128xf32>
    %57 = arith.addf %55, %56 : vector<8x128xf32>
    %58 = vector.extract_strided_slice %49 {offsets = [0, 128], sizes = [8, 128], strides = [1, 1]} : vector<8x512xf32> to vector<8x128xf32>
    %cst_26 = arith.constant 5.000000e-01 : f32
    %59 = vector.broadcast %cst_26 : f32 to vector<8x128xf32>
    %60 = arith.mulf %59, %58 : vector<8x128xf32>
    %61 = math.tanh %60 : vector<8x128xf32>
    %cst_27 = arith.constant 5.000000e-01 : f32
    %62 = vector.broadcast %cst_27 : f32 to vector<8x128xf32>
    %63 = arith.mulf %62, %61 : vector<8x128xf32>
    %cst_28 = arith.constant 5.000000e-01 : f32
    %64 = vector.broadcast %cst_28 : f32 to vector<8x128xf32>
    %65 = arith.addf %63, %64 : vector<8x128xf32>
    %66 = vector.extract_strided_slice %49 {offsets = [0, 256], sizes = [8, 128], strides = [1, 1]} : vector<8x512xf32> to vector<8x128xf32>
    %67 = math.tanh %66 : vector<8x128xf32>
    %68 = vector.extract_strided_slice %49 {offsets = [0, 384], sizes = [8, 128], strides = [1, 1]} : vector<8x512xf32> to vector<8x128xf32>
    %cst_29 = arith.constant 5.000000e-01 : f32
    %69 = vector.broadcast %cst_29 : f32 to vector<8x128xf32>
    %70 = arith.mulf %69, %68 : vector<8x128xf32>
    %71 = math.tanh %70 : vector<8x128xf32>
    %cst_30 = arith.constant 5.000000e-01 : f32
    %72 = vector.broadcast %cst_30 : f32 to vector<8x128xf32>
    %73 = arith.mulf %72, %71 : vector<8x128xf32>
    %cst_31 = arith.constant 5.000000e-01 : f32
    %74 = vector.broadcast %cst_31 : f32 to vector<8x128xf32>
    %75 = arith.addf %73, %74 : vector<8x128xf32>
    %76 = arith.mulf %65, %40 : vector<8x128xf32>
    %77 = arith.mulf %57, %67 : vector<8x128xf32>
    %78 = arith.addf %76, %77 : vector<8x128xf32>
    %79 = math.tanh %78 : vector<8x128xf32>
    %80 = arith.mulf %75, %79 : vector<8x128xf32>
    %c2_i32 = arith.constant 2 : i32
    %81 = arith.index_cast %c2_i32 : i32 to index
    %c0_32 = arith.constant 0 : index
    %c0_33 = arith.constant 0 : index
    %82 = vector.load %arg2[%81, %c0_32, %c0_33] : memref<4x8x512xf32, #tpu.memory_space<vmem>>, vector<1x8x512xf32>
    %83 = vector.shape_cast %82 : vector<1x8x512xf32> to vector<8x512xf32>
    %84 = arith.truncf %80 : vector<8x128xf32> to vector<8x128xbf16>
    %c0_34 = arith.constant 0 : index
    %c0_35 = arith.constant 0 : index
    %85 = vector.load %arg3[%c0_34, %c0_35] : memref<128x512xbf16, #tpu.memory_space<vmem>>, vector<128x512xbf16>
    %cst_36 = arith.constant dense<0.000000e+00> : vector<8x512xf32>
    %86 = tpu.matmul %84, %85, %cst_36 {dimension_numbers = #tpu.dot_dimension_numbers<[1], [0], [0], [1], [0, 0, 1, 1], [], []>} : vector<8x128xbf16>, vector<128x512xbf16>, vector<8x512xf32> -> vector<8x512xf32>
    %87 = arith.addf %83, %86 : vector<8x512xf32>
    %88 = vector.extract_strided_slice %87 {offsets = [0, 0], sizes = [8, 128], strides = [1, 1]} : vector<8x512xf32> to vector<8x128xf32>
    %cst_37 = arith.constant 5.000000e-01 : f32
    %89 = vector.broadcast %cst_37 : f32 to vector<8x128xf32>
    %90 = arith.mulf %89, %88 : vector<8x128xf32>
    %91 = math.tanh %90 : vector<8x128xf32>
    %cst_38 = arith.constant 5.000000e-01 : f32
    %92 = vector.broadcast %cst_38 : f32 to vector<8x128xf32>
    %93 = arith.mulf %92, %91 : vector<8x128xf32>
    %cst_39 = arith.constant 5.000000e-01 : f32
    %94 = vector.broadcast %cst_39 : f32 to vector<8x128xf32>
    %95 = arith.addf %93, %94 : vector<8x128xf32>
    %96 = vector.extract_strided_slice %87 {offsets = [0, 128], sizes = [8, 128], strides = [1, 1]} : vector<8x512xf32> to vector<8x128xf32>
    %cst_40 = arith.constant 5.000000e-01 : f32
    %97 = vector.broadcast %cst_40 : f32 to vector<8x128xf32>
    %98 = arith.mulf %97, %96 : vector<8x128xf32>
    %99 = math.tanh %98 : vector<8x128xf32>
    %cst_41 = arith.constant 5.000000e-01 : f32
    %100 = vector.broadcast %cst_41 : f32 to vector<8x128xf32>
    %101 = arith.mulf %100, %99 : vector<8x128xf32>
    %cst_42 = arith.constant 5.000000e-01 : f32
    %102 = vector.broadcast %cst_42 : f32 to vector<8x128xf32>
    %103 = arith.addf %101, %102 : vector<8x128xf32>
    %104 = vector.extract_strided_slice %87 {offsets = [0, 256], sizes = [8, 128], strides = [1, 1]} : vector<8x512xf32> to vector<8x128xf32>
    %105 = math.tanh %104 : vector<8x128xf32>
    %106 = vector.extract_strided_slice %87 {offsets = [0, 384], sizes = [8, 128], strides = [1, 1]} : vector<8x512xf32> to vector<8x128xf32>
    %cst_43 = arith.constant 5.000000e-01 : f32
    %107 = vector.broadcast %cst_43 : f32 to vector<8x128xf32>
    %108 = arith.mulf %107, %106 : vector<8x128xf32>
    %109 = math.tanh %108 : vector<8x128xf32>
    %cst_44 = arith.constant 5.000000e-01 : f32
    %110 = vector.broadcast %cst_44 : f32 to vector<8x128xf32>
    %111 = arith.mulf %110, %109 : vector<8x128xf32>
    %cst_45 = arith.constant 5.000000e-01 : f32
    %112 = vector.broadcast %cst_45 : f32 to vector<8x128xf32>
    %113 = arith.addf %111, %112 : vector<8x128xf32>
    %114 = arith.mulf %103, %78 : vector<8x128xf32>
    %115 = arith.mulf %95, %105 : vector<8x128xf32>
    %116 = arith.addf %114, %115 : vector<8x128xf32>
    %117 = math.tanh %116 : vector<8x128xf32>
    %118 = arith.mulf %113, %117 : vector<8x128xf32>
    %c3_i32 = arith.constant 3 : i32
    %119 = arith.index_cast %c3_i32 : i32 to index
    %c0_46 = arith.constant 0 : index
    %c0_47 = arith.constant 0 : index
    %120 = vector.load %arg2[%119, %c0_46, %c0_47] : memref<4x8x512xf32, #tpu.memory_space<vmem>>, vector<1x8x512xf32>
    %121 = vector.shape_cast %120 : vector<1x8x512xf32> to vector<8x512xf32>
    %122 = arith.truncf %118 : vector<8x128xf32> to vector<8x128xbf16>
    %c0_48 = arith.constant 0 : index
    %c0_49 = arith.constant 0 : index
    %123 = vector.load %arg3[%c0_48, %c0_49] : memref<128x512xbf16, #tpu.memory_space<vmem>>, vector<128x512xbf16>
    %cst_50 = arith.constant dense<0.000000e+00> : vector<8x512xf32>
    %124 = tpu.matmul %122, %123, %cst_50 {dimension_numbers = #tpu.dot_dimension_numbers<[1], [0], [0], [1], [0, 0, 1, 1], [], []>} : vector<8x128xbf16>, vector<128x512xbf16>, vector<8x512xf32> -> vector<8x512xf32>
    %125 = arith.addf %121, %124 : vector<8x512xf32>
    %126 = vector.extract_strided_slice %125 {offsets = [0, 0], sizes = [8, 128], strides = [1, 1]} : vector<8x512xf32> to vector<8x128xf32>
    %cst_51 = arith.constant 5.000000e-01 : f32
    %127 = vector.broadcast %cst_51 : f32 to vector<8x128xf32>
    %128 = arith.mulf %127, %126 : vector<8x128xf32>
    %129 = math.tanh %128 : vector<8x128xf32>
    %cst_52 = arith.constant 5.000000e-01 : f32
    %130 = vector.broadcast %cst_52 : f32 to vector<8x128xf32>
    %131 = arith.mulf %130, %129 : vector<8x128xf32>
    %cst_53 = arith.constant 5.000000e-01 : f32
    %132 = vector.broadcast %cst_53 : f32 to vector<8x128xf32>
    %133 = arith.addf %131, %132 : vector<8x128xf32>
    %134 = vector.extract_strided_slice %125 {offsets = [0, 128], sizes = [8, 128], strides = [1, 1]} : vector<8x512xf32> to vector<8x128xf32>
    %cst_54 = arith.constant 5.000000e-01 : f32
    %135 = vector.broadcast %cst_54 : f32 to vector<8x128xf32>
    %136 = arith.mulf %135, %134 : vector<8x128xf32>
    %137 = math.tanh %136 : vector<8x128xf32>
    %cst_55 = arith.constant 5.000000e-01 : f32
    %138 = vector.broadcast %cst_55 : f32 to vector<8x128xf32>
    %139 = arith.mulf %138, %137 : vector<8x128xf32>
    %cst_56 = arith.constant 5.000000e-01 : f32
    %140 = vector.broadcast %cst_56 : f32 to vector<8x128xf32>
    %141 = arith.addf %139, %140 : vector<8x128xf32>
    %142 = vector.extract_strided_slice %125 {offsets = [0, 256], sizes = [8, 128], strides = [1, 1]} : vector<8x512xf32> to vector<8x128xf32>
    %143 = math.tanh %142 : vector<8x128xf32>
    %144 = vector.extract_strided_slice %125 {offsets = [0, 384], sizes = [8, 128], strides = [1, 1]} : vector<8x512xf32> to vector<8x128xf32>
    %cst_57 = arith.constant 5.000000e-01 : f32
    %145 = vector.broadcast %cst_57 : f32 to vector<8x128xf32>
    %146 = arith.mulf %145, %144 : vector<8x128xf32>
    %147 = math.tanh %146 : vector<8x128xf32>
    %cst_58 = arith.constant 5.000000e-01 : f32
    %148 = vector.broadcast %cst_58 : f32 to vector<8x128xf32>
    %149 = arith.mulf %148, %147 : vector<8x128xf32>
    %cst_59 = arith.constant 5.000000e-01 : f32
    %150 = vector.broadcast %cst_59 : f32 to vector<8x128xf32>
    %151 = arith.addf %149, %150 : vector<8x128xf32>
    %152 = arith.mulf %141, %116 : vector<8x128xf32>
    %153 = arith.mulf %133, %143 : vector<8x128xf32>
    %154 = arith.addf %152, %153 : vector<8x128xf32>
    %155 = math.tanh %154 : vector<8x128xf32>
    %156 = arith.mulf %151, %155 : vector<8x128xf32>
    %c4_i32 = arith.constant 4 : i32
    %c0_60 = arith.constant 0 : index
    %c0_61 = arith.constant 0 : index
    %157 = vector.load %arg6[%c0_60, %c0_61] : memref<8x128xf32, #tpu.memory_space<vmem>>, vector<8x128xf32>
    tpu.vector_store %arg6[%c0_60, %c0_61], %156 {strides = array<i32>} : memref<8x128xf32, #tpu.memory_space<vmem>>, vector<8x128xf32>,
    %c0_62 = arith.constant 0 : index
    %c0_63 = arith.constant 0 : index
    %158 = vector.load %arg7[%c0_62, %c0_63] : memref<8x128xf32, #tpu.memory_space<vmem>>, vector<8x128xf32>
    tpu.vector_store %arg7[%c0_62, %c0_63], %154 {strides = array<i32>} : memref<8x128xf32, #tpu.memory_space<vmem>>, vector<8x128xf32>,
    return
  }
  func.func @transform_0(%arg0: i32, %arg1: i32) -> (i32, i32, i32) {
    %c0_i32 = arith.constant 0 : i32
    %c0_i32_0 = arith.constant 0 : i32
    return %arg1, %arg0, %c0_i32 : i32, i32, i32
  }
  func.func @transform_1(%arg0: i32, %arg1: i32) -> (i32, i32) {
    %c0_i32 = arith.constant 0 : i32
    %c0_i32_0 = arith.constant 0 : i32
    %c0_i32_1 = arith.constant 0 : i32
    return %c0_i32, %c0_i32_0 : i32, i32
  }
  func.func @transform_2(%arg0: i32, %arg1: i32) -> (i32, i32) {
    %c0_i32 = arith.constant 0 : i32
    %c0_i32_0 = arith.constant 0 : i32
    return %arg0, %c0_i32 : i32, i32
  }
  func.func @transform_3(%arg0: i32, %arg1: i32) -> (i32, i32) {
    %c0_i32 = arith.constant 0 : i32
    %c0_i32_0 = arith.constant 0 : i32
    return %arg0, %c0_i32 : i32, i32
  }
  func.func @transform_4(%arg0: i32, %arg1: i32) -> (i32, i32) {
    %c0_i32 = arith.constant 0 : i32
    %c0_i32_0 = arith.constant 0 : i32
    return %arg0, %c0_i32 : i32, i32
  }
  func.func @transform_5(%arg0: i32, %arg1: i32) -> (i32, i32) {
    %c0_i32 = arith.constant 0 : i32
    %c0_i32_0 = arith.constant 0 : i32
    return %arg0, %c0_i32 : i32, i32
  }
}

</mosaic_0001>

<bundles_post_ra>
// kernel: tpu_custom_call.1
= control target key start
LH: loop header
LB: loop body
LE: loop exit
PB: predicated region body
PF: predicated region fallthrough
CT: control target
= control target key end

     0   :  { %11 = vsyncpa [#allocation3], 0  ;;  %s2050_s0 = inlined_call_operand.hbm [shape: f32[8,8,512], index: 0, kind: input, shape index: {}]   ;;  %s2051_s1 = inlined_call_operand.hbm [shape: bf16[128,512], index: 1, kind: input, shape index: {}]   ;;  %s2052_s2 = inlined_call_operand.hbm [shape: f32[8,128], index: 2, kind: input, shape index: {}]   ;;  %s2053_s3 = inlined_call_operand.vmem [shape: f32[8,128], index: 3, kind: input, shape index: {}]   ;;  %s2054_s4 = inlined_call_operand.hbm [shape: f32[8,128], index: 4, kind: output, shape index: {0}]   ;;  %s2055_s5 = inlined_call_operand.hbm [shape: f32[8,128], index: 5, kind: output, shape index: {1}]  }
   0x1   :  { %13 = vsyncpa [#allocation3 + $0x1], 0 }
   0x2   :  { %14 = vsyncpa [#allocation6], 0 }
   0x3   :  { %15 = vsyncpa [#allocation4], 0 }
   0x4   :  { %16 = vsyncpa [#allocation10], 0  ;;  %s1580_s18 = smov 0   ;;  %s1582_s19 = smov 0  }
   0x5   :  { %s1584_s20 = smov 0   ;;  %s1586_s21 = smov 0  }
   0x6   :  { %s1588_s22 = smov 0   ;;  %s1590_s23 = smov 0  }
   0x7 LB: > { %s1088_s24 = sadd.s32 4294967295, %s1538_s23   ;;  %p56_p0 = scmp.ne.s32.totalorder %s1522_s19, %s1518_s18  ;;  %s1538_s23 = sphi %s1590_s23, %s22_s23   ;;  %s1534_s22 = sphi %s1588_s22, %s2073_s22   ;;  %s1530_s21 = sphi %s1586_s21, %s2072_s21   ;;  %s1526_s20 = sphi %s1584_s20, %s2071_s20   ;;  %s1522_s19 = sphi %s1582_s19, %s2070_s19   ;;  %s1518_s18 = sphi %s1580_s18, %s2069_s18  }
   0x8   : > { %p1612_p1 = scmp.eq.s32.totalorder %s1088_s24, 0  ;;  %p1089_p2 = scmp.ge.s32.totalorder %s1538_s23, 1 }
   0x9   : > { %p192_p3 = scmp.lt.s32.totalorder %s1538_s23, 3  ;;  %s1540_s28 = smov [#allocation5]  }
   0xa   : > { %s2060_s25 = scalar_select %p1612_p1, 1, 0 }
   0xb   : > { %p1620_p4 = por %p1612_p1, %p56_p0  ;;  %p1624_p5 = pnand %p1089_p2, %p192_p3 }
   0xc   : > { %s204_s29 = sshll.u32 %s1540_s28, 4  ;;  %s1541_s6 = smov [#allocation7]   ;;  %s205_s29 = int_to_ptr.vmem [resolvable:$true] %s204_s29 }
   0xd   : > { %s2061_s26 = scalar_select %p1620_p4, 1, 0 }
   0xe   : > { %s2062_s27 = scalar_select %p1624_p5, 1, 0 }
   0xf   : > { %p1173_p6 = pneg %p1624_p5  ;;  %s220_s7 = sshll.u32 %s1541_s6, 4  ;;  %s1636_s7 = int_to_ptr.vmem [resolvable:$true] %s220_s7 }
  0x10   : > { %s1338_s10 = scalar_lea.hbm %s2051_s1, 4096 }
  0x11   : > { %p1632_p7 = pnand %p1173_p6, %p1612_p1  ;;  %p1339_p8 = scmp.ne.s32.totalorder %s2051_s1, %s1338_s10 }
  0x12   : > { %p1345_p12 = scmp.lt.u32.totalorder %s1338_s10, %s2051_s1 }
  0x13   : > { %p1340_p9 = pneg %p1632_p7 }
  0x15   : > { %p1341_p10 = pnand %p1340_p9, %p1339_p8 }
  0x17   : > { %p1342_p11 = pneg %p1341_p10 }
  0x19   : > { %p1347_p13 = pnand %p1345_p12, %p1342_p11 }
  0x1b   : > { %1350 = shalt.err (!%p1347_p13)
}
  0x1c   : > { %s1351_s15 = scalar_lea.vmem %s205_s29, 4096  ;;  %p1359_p6 = scmp.lt.s32.totalorder %s205_s29, %s205_s29 }
  0x1d   : > { %p1352_p0 = scmp.ne.s32.totalorder %s205_s29, %s1351_s15  ;;  %p1360_p1 = scmp.lt.s32.totalorder %s1351_s15, %s1351_s15 }
  0x1f   : > { %p1354_p2 = pnand %p1352_p0, %p1340_p9  ;;  %p1361_p4 = por %p1360_p1, %p1359_p6 }
  0x21   : > { %p1355_p3 = pneg %p1354_p2 }
  0x23   : > { %p1362_p5 = pnand %p1361_p4, %p1355_p3 }
  0x25   : > { %1365 = shalt.err (!%p1362_p5)
}
  0x26   : > { %s1542_s16 = smov 256   ;;  %s1543_s17 = smov 16  }
  0x27   : > { %1176 = dma.hbm_to_vmem [thread:$0]  (!%p1632_p7), %s2051_s1, 4096, %s205_s29, [#allocation6], %s1542_s16, %s1542_s16, %s1543_s17  }
  0x28   : > { %s1366_s9 = scalar_lea.hbm %s2052_s2, 128 }
  0x29   : > { %p1367_p8 = scmp.ne.s32.totalorder %s2052_s2, %s1366_s9  ;;  %p1373_p5 = scmp.lt.u32.totalorder %s1366_s9, %s2052_s2 }
  0x2b   : > { %p1369_p1 = pnand %p1367_p8, %p1340_p9 }
  0x2d   : > { %p1370_p4 = pneg %p1369_p1 }
  0x2f   : > { %p1375_p10 = pnand %p1373_p5, %p1370_p4 }
  0x31   : > { %1378 = shalt.err (!%p1375_p10)
}
  0x32   : > { %s1379_s29 = scalar_lea.vmem %s1636_s7, 128  ;;  %p1387_p0 = scmp.lt.s32.totalorder %s1636_s7, %s1636_s7 }
  0x33   : > { %p1380_p11 = scmp.ne.s32.totalorder %s1636_s7, %s1379_s29  ;;  %p1388_p2 = scmp.lt.s32.totalorder %s1379_s29, %s1379_s29 }
  0x35   : > { %p1382_p12 = pnand %p1380_p11, %p1340_p9  ;;  %p1389_p3 = por %p1388_p2, %p1387_p0 }
  0x37   : > { %p1383_p13 = pneg %p1382_p12 }
  0x39   : > { %p1390_p6 = pnand %p1389_p3, %p1383_p13 }
  0x3b   : > { %1393 = shalt.err (!%p1390_p6)
}
  0x3c   : > { %1179 = dma.hbm_to_vmem [thread:$0]  (!%p1632_p7), %s2052_s2, 128, %s1636_s7, [#allocation6]  }
  0x3d   : > { %s31_s16 = sadd.s32 1, %s1534_s22  ;;  %s43_s17 = sadd.s32 1, %s1526_s20 }
  0x3e   : > { %p32_p9 = scmp.ge.s32.totalorder %s31_s16, 2  ;;  %p50_p8 = scmp.ne.s32.totalorder %s1526_s20, %s1522_s19 }
  0x3f   : > { %p51_p1 = scmp.eq.s32.totalorder %s1538_s23, 0  ;;  %p1186_p4 = scmp.lt.s32.totalorder %s1538_s23, 2 }
  0x40   : > { %s2075_s16 = smov (%p32_p9, %s31_s16), 0  ;;  %s238_s30 = sand.u32 1, %s1526_s20  }
  0x41   : > { %p52_p5 = por %p51_p1, %p50_p8  ;;  %s38_s18 = ssub.s32 %s1534_s22, %s2075_s16 }
  0x42   : > { %p41_p10 = scmp.eq.s32.totalorder %s38_s18, 0  ;;  %s1094_s28 = sshll.u32 %s238_s30, 7 }
  0x43   : > { %s1154_s6 = sshll.u32 %s1534_s22, 11  ;;  %s242_s11 = scalar_lea.vmem [#allocation2], %s1094_s28 }
  0x44   : > { %s1698_s8 = scalar_select %p41_p10, %s1526_s20, %s43_s17  }
  0x45   : > { %s1703_s10 = scalar_lea.hbm %s2050_s0, %s1154_s6  ;;  %s252_s12 = sshll.u32 %s242_s11, 4  ;;  %s1705_s12 = int_to_ptr.vmem [resolvable:$true] %s252_s12 }
  0x46   : > { %p1709_p7 = pnand %p1186_p4, %p52_p5  ;;  %s1713_s29 = scalar_lea.sflag [#allocation3], %s238_s30 }
  0x47   : > { %s1394_s14 = scalar_lea.hbm %s1703_s10, 2048  ;;  %s1399_s18 = scalar_lea.hbm %s2050_s0, 4096 }
  0x48   : > { %p1395_p11 = scmp.ne.s32.totalorder %s1703_s10, %s1394_s14  ;;  %p1396_p12 = pneg %p1709_p7 }
  0x49   : > { %p1400_p2 = scmp.lt.u32.totalorder %s1703_s10, %s2050_s0  ;;  %p1401_p3 = scmp.lt.u32.totalorder %s1399_s18, %s1394_s14 }
  0x4a   : > { %p1397_p13 = pnand %p1396_p12, %p1395_p11  ;;  %p1403_p9 = scmp.lt.u32.totalorder %s1394_s14, %s1703_s10 }
  0x4b   : > { %p1402_p6 = por %p1401_p3, %p1400_p2 }
  0x4c   : > { %p1398_p0 = pneg %p1397_p13 }
  0x4d   : > { %p1404_p8 = por %p1403_p9, %p1402_p6 }
  0x4f   : > { %p1405_p1 = pnand %p1404_p8, %p1398_p0 }
  0x51   : > { %1408 = shalt.err (!%p1405_p1)
}
  0x52   : > { %s1409_s30 = scalar_lea.vmem %s1705_s12, 2048  ;;  %s1544_s9 = smov [#allocation2]  }
  0x53   : > { %p1410_p4 = scmp.ne.s32.totalorder %s1705_s12, %s1409_s30  ;;  %s1414_s7 = sshll.u32 %s1544_s9, 4  ;;  %s1415_s7 = int_to_ptr.vmem [resolvable:$false] %s1414_s7 }
  0x54   : > { %s1416_s11 = scalar_lea.vmem %s1415_s7, 4096  ;;  %p1417_p11 = scmp.lt.s32.totalorder %s1705_s12, %s1415_s7 }
  0x55   : > { %p1412_p5 = pnand %p1410_p4, %p1396_p12  ;;  %p1418_p13 = scmp.lt.s32.totalorder %s1416_s11, %s1409_s30 }
  0x57   : > { %p1413_p10 = pneg %p1412_p5  ;;  %p1419_p2 = por %p1418_p13, %p1417_p11 }
  0x59   : > { %p1420_p3 = pnand %p1419_p2, %p1413_p10 }
  0x5b   : > { %1423 = shalt.err (!%p1420_p3)
}
  0x5c   : > { %s1545_s14 = smov 512   ;;  %s1546_s15 = smov 32  }
  0x5d   : > { %1183 = dma.hbm_to_vmem [thread:$0]  (!%p1709_p7), %s1703_s10, 2048, %s1705_s12, %s1713_s29, %s1545_s14, %s1545_s14, %s1546_s15  }
  0x5e   : > { %p2065_p12 = scmp.ne.s32.totalorder %s2062_s27, 0 }
  0x5f   : > { %s266_s17 = sand.u32 (!%p2065_p12), 1, %s1522_s19   ;;  %p2066_p0 = scmp.ne.s32.totalorder (!%p2065_p12), %s2061_s26, 0 }
  0x60   : > { %264 = sbr.rel (%p2065_p12) target bundleno = 1179 (0x49b), region = 36  ;;  %s1099_s18 = sshll.u32 (!%p2065_p12), %s266_s17, 7 }
  0x61   : > { %s267_s28 = scalar_lea.sflag (!%p2065_p12), [#allocation3], %s266_s17  ;;  %s1744_s6 = scalar_lea.vmem (!%p2065_p12), [#allocation2], %s1099_s18 }
  0x67   : > { %1501 = dma.done.wait (%p2066_p0), %s267_s28, 2048  }
  0x68   : > { %1503 = vsyncadd (%p2066_p0), %s267_s28, 4294965248  ;;  %p2067_p6 = scmp.ne.s32.totalorder %s2060_s25, 0 }
  0x6a   : > { %1505 = dma.done.wait (%p2067_p6), [#allocation6], 4224  }
  0x6b   : > { %1507 = vsyncadd (%p2067_p6), [#allocation6], 4294963072  ;;  %p1102_p7 = scmp.ne.s32.totalorder %s1530_s21, 0 }
  0x6c   : > { %v314_v0 = vld [vmem:[#allocation7] sm:$0xff] (!%p1102_p7) }
  0x6d   : > { %313 = sbr.rel (%p1102_p7) target bundleno = 116 (0x74), region = 52  ;;  %v316_v1 = vld [vmem:[%s2053_s3] sm:$0xff] (!%p1102_p7)  ;;  %315 = vst [vmem:[#allocation8] sm:$0xff] (!%p1102_p7), %v314_v0 }
  0x6e   : > { %317 = vst [vmem:[#allocation9] sm:$0xff] (!%p1102_p7), %v316_v1 }
  0x74 PF: > { %v1758_v2 = vld [vmem:[#allocation5 + $0x4] ss:$16 sps:$4 sm:$0xff]   ;;  %v1760_v3 = vld [vmem:[#allocation5] ss:$16 sps:$4 sm:$0xff]   ;;  %v1547_v4 = vmov 0   ;;  %v318_v33 = vld [vmem:[#allocation8] sm:$0xff] }
  0x75   : > { %549 = vmatprep.mubr.bf16.mxu0 %v1547_v4  ;;  %590 = vmatprep.mubr.bf16.mxu1 %v1547_v4  ;;  %v1765_v5 = vld [vmem:[#allocation5 + $0x24] ss:$16 sps:$4 sm:$0xff]   ;;  %v1768_v6 = vld [vmem:[#allocation5 + $0xc] ss:$16 sps:$4 sm:$0xff]   ;;  %v1770_v7 = vld [vmem:[#allocation5 + $0x20] ss:$16 sps:$4 sm:$0xff]   ;;  %v324_v35 = vpack.c.bf16 %v318_v33, %v318_v33 }
  0x76   : > { %517 = vmatprep.subr.bf16.mxu0 %v1758_v2  ;;  %v1772_v8 = vld [vmem:[#allocation5 + $0x8] ss:$16 sps:$4 sm:$0xff]   ;;  %v1775_v9 = vld [vmem:[#allocation5 + $0x44] ss:$16 sps:$4 sm:$0xff]   ;;  %558 = vmatprep.subr.bf16.mxu1 %v1768_v6  ;;  %v1778_v10 = vld [vmem:[#allocation5 + $0x2c] ss:$16 sps:$4 sm:$0xff]  }
  0x77   : > { %518 = vmatpush1.bf16.msra.mxu0 %v1760_v3  ;;  %559 = vmatpush1.bf16.msra.mxu1 %v1772_v8  ;;  %v1781_v11 = vld [vmem:[#allocation5 + $0x28] ss:$16 sps:$4 sm:$0xff]   ;;  %v1785_v12 = vld [vmem:[#allocation5 + $0x40] ss:$16 sps:$4 sm:$0xff]   ;;  %v1788_v13 = vld [vmem:[#allocation5 + $0x64] ss:$16 sps:$4 sm:$0xff]  }
  0x78   : > { %519 = vmatprep.subr.bf16.mxu0 %v1765_v5  ;;  %560 = vmatprep.subr.bf16.mxu1 %v1778_v10  ;;  %v1790_v14 = vld [vmem:[#allocation5 + $0x4c] ss:$16 sps:$4 sm:$0xff]   ;;  %v1793_v15 = vld [vmem:[#allocation5 + $0x48] ss:$16 sps:$4 sm:$0xff]   ;;  %v1797_v16 = vld [vmem:[#allocation5 + $0x60] ss:$16 sps:$4 sm:$0xff]  }
  0x79   : > { %v1799_v17 = vld [vmem:[#allocation5 + $0x6c] ss:$16 sps:$4 sm:$0xff]   ;;  %v1802_v18 = vld [vmem:[#allocation5 + $0x84] ss:$16 sps:$4 sm:$0xff]   ;;  %v1805_v19 = vld [vmem:[#allocation5 + $0x80] ss:$16 sps:$4 sm:$0xff]  }
  0x7a   : > { %v1807_v20 = vld [vmem:[#allocation5 + $0x68] ss:$16 sps:$4 sm:$0xff]   ;;  %v1811_v21 = vld [vmem:[#allocation5 + $0x8c] ss:$16 sps:$4 sm:$0xff]   ;;  %v1814_v22 = vld [vmem:[#allocation5 + $0xa4] ss:$16 sps:$4 sm:$0xff]  }
  0x7b   : > { %520 = vmatpush1.bf16.msra.mxu0 %v1770_v7  ;;  %561 = vmatpush1.bf16.msra.mxu1 %v1781_v11  ;;  %v1817_v23 = vld [vmem:[#allocation5 + $0x88] ss:$16 sps:$4 sm:$0xff]   ;;  %v1821_v24 = vld [vmem:[#allocation5 + $0xa0] ss:$16 sps:$4 sm:$0xff]   ;;  %v1823_v25 = vld [vmem:[#allocation5 + $0xac] ss:$16 sps:$4 sm:$0xff]  }
  0x7c   : > { %521 = vmatprep.subr.bf16.mxu0 %v1775_v9  ;;  %562 = vmatprep.subr.bf16.mxu1 %v1790_v14  ;;  %v1826_v26 = vld [vmem:[#allocation5 + $0xc4] ss:$16 sps:$4 sm:$0xff]   ;;  %v1829_v27 = vld [vmem:[#allocation5 + $0xa8] ss:$16 sps:$4 sm:$0xff]   ;;  %v1833_v28 = vld [vmem:[#allocation5 + $0xc0] ss:$16 sps:$4 sm:$0xff]  }
  0x7d   : > { %v1835_v29 = vld [vmem:[#allocation5 + $0xcc] ss:$16 sps:$4 sm:$0xff]   ;;  %v1838_v30 = vld [vmem:[#allocation5 + $0xe4] ss:$16 sps:$4 sm:$0xff]   ;;  %v1841_v31 = vld [vmem:[#allocation5 + $0xc8] ss:$16 sps:$4 sm:$0xff]  }
  0x7e   : > { %v1845_v32 = vld [vmem:[#allocation5 + $0xe0] ss:$16 sps:$4 sm:$0xff]   ;;  %v1847_v34 = vld [vmem:[#allocation5 + $0xec] ss:$16 sps:$4 sm:$0xff]   ;;  %v1851_v36 = vld [vmem:[#allocation5 + $0xe8] ss:$16 sps:$4 sm:$0xff]  }
  0x7f   : > { %522 = vmatpush1.bf16.msra.mxu0 %v1785_v12  ;;  %563 = vmatpush1.bf16.msra.mxu1 %v1793_v15  ;;  %v320_v37 = vld [vmem:[%s1744_s6] sm:$0xff]  ;;  %v321_v38 = vld [vmem:[%s1744_s6 + $0x8] sm:$0xff]  ;;  %v322_v42 = vld [vmem:[%s1744_s6 + $0x10] sm:$0xff]  ;;  %s1548_s21 = smov [#allocation9]   ;;  %p1984_p9 = scmp.eq.s32.totalorder %s1088_s24, 1 }
  0x80   : > { %523 = vmatprep.subr.bf16.mxu0 %v1788_v13  ;;  %564 = vmatprep.subr.bf16.mxu1 %v1799_v17  ;;  %v323_v52 = vld [vmem:[%s1744_s6 + $0x18] sm:$0xff]  ;;  %v319_v62 = vld [vmem:[#allocation9] sm:$0xff]  ;;  %s975_s25 = sshll.u32 %s1548_s21, 4  ;;  %s976_s25 = int_to_ptr.vmem [resolvable:$true] %s975_s25 }
  0x81   : > { %s1424_s12 = scalar_lea.vmem %s976_s25, 128  ;;  %p1431_p5 = scmp.lt.s32.totalorder %s976_s25, %s976_s25 }
  0x82   : > { %p1425_p8 = scmp.ne.s32.totalorder %s976_s25, %s1424_s12  ;;  %p1432_p10 = scmp.lt.s32.totalorder %s1424_s12, %s1424_s12 }
  0x83   : > { %524 = vmatpush1.bf16.msra.mxu0 %v1797_v16  ;;  %565 = vmatpush1.bf16.msra.mxu1 %v1807_v20 }
  0x84   : > { %525 = vmatprep.subr.bf16.mxu0 %v1802_v18  ;;  %566 = vmatprep.subr.bf16.mxu1 %v1811_v21  ;;  %p1426_p1 = pnand %p1425_p8, %p1984_p9  ;;  %p1433_p11 = por %p1432_p10, %p1431_p5 }
  0x86   : > { %p1427_p4 = pneg %p1426_p1 }
  0x87   : > { %526 = vmatpush1.bf16.msra.mxu0 %v1805_v19  ;;  %567 = vmatpush1.bf16.msra.mxu1 %v1817_v23 }
  0x88   : > { %527 = vmatprep.subr.bf16.mxu0 %v1814_v22  ;;  %568 = vmatprep.subr.bf16.mxu1 %v1823_v25  ;;  %p1434_p13 = pnand %p1433_p11, %p1427_p4 }
  0x8b   : > { %528 = vmatpush1.bf16.msra.mxu0 %v1821_v24  ;;  %569 = vmatpush1.bf16.msra.mxu1 %v1829_v27 }
  0x8c   : > { %529 = vmatprep.subr.bf16.mxu0 %v1826_v26  ;;  %570 = vmatprep.subr.bf16.mxu1 %v1835_v29 }
  0x8f   : > { %530 = vmatpush1.bf16.msra.mxu0 %v1833_v28  ;;  %571 = vmatpush1.bf16.msra.mxu1 %v1841_v31 }
  0x90   : > { %531 = vmatprep.subr.bf16.mxu0 %v1838_v30  ;;  %572 = vmatprep.subr.bf16.mxu1 %v1847_v34 }
  0x93   : > { %532 = vmatpush1.bf16.msra.mxu0 %v1845_v32  ;;  %573 = vmatpush1.bf16.msra.mxu1 %v1851_v36 }
  0x94   : > { %627 = vmatprep.subr.bf16.mxu0 %v1758_v2  ;;  %668 = vmatprep.subr.bf16.mxu1 %v1768_v6 }
  0x96   : > { %550 = vmatmul.mubr.bf16.vlgmr.msra.gmra.mrb[0].mxu0 %v324_v35  ;;  %591 = vmatmul.mubr.bf16.vlgmr.msra.gmra.mrb[0].mxu1 %v324_v35 }
  0x97   : > { %628 = vmatpush1.bf16.msra.mxu0 %v1760_v3  ;;  %659 = vmatprep.mubr.bf16.mxu0 %v1547_v4 }
  0x98   : > { %629 = vmatprep.subr.bf16.mxu0 %v1765_v5  ;;  %669 = vmatpush1.bf16.msra.mxu1 %v1772_v8 }
  0x99   : > { %700 = vmatprep.mubr.bf16.mxu1 %v1547_v4  ;;  %670 = vmatprep.subr.bf16.mxu1 %v1778_v10 }
  0x9b   : > { %630 = vmatpush1.bf16.msra.mxu0 %v1770_v7 }
  0x9c   : > { %631 = vmatprep.subr.bf16.mxu0 %v1775_v9  ;;  %671 = vmatpush1.bf16.msra.mxu1 %v1781_v11 }
  0x9d   : > { %672 = vmatprep.subr.bf16.mxu1 %v1790_v14 }
  0x9f   : > { %632 = vmatpush1.bf16.msra.mxu0 %v1785_v12 }
  0xa0   : > { %633 = vmatprep.subr.bf16.mxu0 %v1788_v13  ;;  %673 = vmatpush1.bf16.msra.mxu1 %v1793_v15 }
  0xa1   : > { %674 = vmatprep.subr.bf16.mxu1 %v1799_v17 }
  0xa3   : > { %634 = vmatpush1.bf16.msra.mxu0 %v1797_v16 }
  0xa4   : > { %635 = vmatprep.subr.bf16.mxu0 %v1802_v18  ;;  %675 = vmatpush1.bf16.msra.mxu1 %v1807_v20 }
  0xa5   : > { %676 = vmatprep.subr.bf16.mxu1 %v1811_v21 }
  0xa7   : > { %636 = vmatpush1.bf16.msra.mxu0 %v1805_v19 }
  0xa8   : > { %637 = vmatprep.subr.bf16.mxu0 %v1814_v22  ;;  %677 = vmatpush1.bf16.msra.mxu1 %v1817_v23 }
  0xa9   : > { %678 = vmatprep.subr.bf16.mxu1 %v1823_v25 }
  0xab   : > { %638 = vmatpush1.bf16.msra.mxu0 %v1821_v24 }
  0xac   : > { %639 = vmatprep.subr.bf16.mxu0 %v1826_v26  ;;  %679 = vmatpush1.bf16.msra.mxu1 %v1829_v27 }
  0xad   : > { %680 = vmatprep.subr.bf16.mxu1 %v1835_v29 }
  0xaf   : > { %640 = vmatpush1.bf16.msra.mxu0 %v1833_v28 }
  0xb0   : > { %641 = vmatprep.subr.bf16.mxu0 %v1838_v30  ;;  %681 = vmatpush1.bf16.msra.mxu1 %v1841_v31 }
  0xb1   : > { %682 = vmatprep.subr.bf16.mxu1 %v1847_v34 }
  0xb3   : > { %642 = vmatpush1.bf16.msra.mxu0 %v1845_v32 }
  0xb4   : > { %737 = vmatprep.subr.bf16.mxu0 %v1758_v2  ;;  %683 = vmatpush1.bf16.msra.mxu1 %v1851_v36 }
  0xb5   : > { %778 = vmatprep.subr.bf16.mxu1 %v1768_v6 }
 0x169   : > { %v551_v39 = vpop.f32.mrb[0].mxu0  ;;  %v592_v47 = vpop.f32.mrb[0].mxu1 }
 0x16a   : > { %v599_v40 = vadd.f32 %v551_v39, %v320_v37  ;;  %v553_v41 = vpop.f32.mrb[1].mxu0  ;;  %v601_v49 = vadd.f32 %v592_v47, %v322_v42  ;;  %v594_v50 = vpop.f32.mrb[1].mxu1  ;;  %v1135_v42 = vld [vmem:[%s1744_s6 + $0x20] sm:$0xff] }
 0x16b   : > { %v600_v43 = vadd.f32 %v553_v41, %v321_v38  ;;  %v555_v44 = vpop.f32.mrb[2].mxu0  ;;  %v596_v51 = vpop.f32.mrb[2].mxu1  ;;  %v602_v54 = vadd.f32 %v594_v50, %v323_v52 }
 0x16c   : > { %v603_v45 = vmul.f32 0.5, %v599_v40  ;;  %v556_v46 = vpop.f32.mrb[3].mxu0  ;;  %v597_v53 = vpop.f32.mrb[3].mxu1 }
 0x16d   : > { %v607_v48 = vmul.f32 0.5, %v600_v43  ;;  %v612_v55 = vmul.f32 0.5, %v602_v54  ;;  %v1136_v43 = vld [vmem:[%s1744_s6 + $0x28] sm:$0xff] }
 0x16e   : > { %1298 = vtanh.f32 %v603_v45 }
 0x16f   : > { %1300 = vtanh.f32 %v607_v48 }
 0x170   : > { %1302 = vtanh.f32 %v601_v49  ;;  %v1137_v49 = vld [vmem:[%s1744_s6 + $0x30] sm:$0xff] }
 0x171   : > { %1304 = vtanh.f32 %v612_v55 }
 0x178   : > { %v1299_v56 = vpop.eup %1298 }
 0x179   : > { %v1301_v57 = vpop.eup %1300  ;;  %v605_v58 = vmul.f32 0.5, %v1299_v56 }
 0x17a   : > { %v1303_v59 = vpop.eup %1302  ;;  %v609_v60 = vmul.f32 0.5, %v1301_v57 }
 0x17b   : > { %v606_v61 = vadd.f32 0.5, %v605_v58  ;;  %v1305_v35 = vpop.eup %1304 }
 0x17c   : > { %v610_v63 = vadd.f32 0.5, %v609_v60  ;;  %v614_v37 = vmul.f32 0.5, %v1305_v35 }
 0x17d   : > { %v617_v0 = vmul.f32 %v1303_v59, %v606_v61 }
 0x17e   : > { %v616_v1 = vmul.f32 %v610_v63, %v319_v62  ;;  %v615_v38 = vadd.f32 0.5, %v614_v37 }
 0x180   : > { %v1896_v33 = vadd.f32 %v617_v0, %v616_v1 }
 0x182   : > { %1306 = vtanh.f32 %v1896_v33 }
 0x18c   : > { %v1307_v39 = vpop.eup %1306 }
 0x18d   : > { %v620_v40 = vmul.f32 %v1307_v39, %v615_v38 }
 0x18f   : > { %v626_v41 = vpack.c.bf16 %v620_v40, %v620_v40 }
 0x191   : > { %660 = vmatmul.mubr.bf16.vlgmr.msra.gmra.mrb[4].mxu0 %v626_v41  ;;  %701 = vmatmul.mubr.bf16.vlgmr.msra.gmra.mrb[4].mxu1 %v626_v41 }
 0x192   : > { %738 = vmatpush1.bf16.msra.mxu0 %v1760_v3  ;;  %779 = vmatpush1.bf16.msra.mxu1 %v1772_v8 }
 0x193   : > { %739 = vmatprep.subr.bf16.mxu0 %v1765_v5  ;;  %780 = vmatprep.subr.bf16.mxu1 %v1778_v10 }
 0x194   : > { %769 = vmatprep.mubr.bf16.mxu0 %v1547_v4  ;;  %810 = vmatprep.mubr.bf16.mxu1 %v1547_v4 }
 0x196   : > { %740 = vmatpush1.bf16.msra.mxu0 %v1770_v7  ;;  %781 = vmatpush1.bf16.msra.mxu1 %v1781_v11 }
 0x197   : > { %741 = vmatprep.subr.bf16.mxu0 %v1775_v9  ;;  %782 = vmatprep.subr.bf16.mxu1 %v1790_v14 }
 0x19a   : > { %742 = vmatpush1.bf16.msra.mxu0 %v1785_v12  ;;  %783 = vmatpush1.bf16.msra.mxu1 %v1793_v15 }
 0x19b   : > { %743 = vmatprep.subr.bf16.mxu0 %v1788_v13  ;;  %784 = vmatprep.subr.bf16.mxu1 %v1799_v17 }
 0x19e   : > { %744 = vmatpush1.bf16.msra.mxu0 %v1797_v16  ;;  %785 = vmatpush1.bf16.msra.mxu1 %v1807_v20 }
 0x19f   : > { %745 = vmatprep.subr.bf16.mxu0 %v1802_v18  ;;  %786 = vmatprep.subr.bf16.mxu1 %v1811_v21 }
 0x1a2   : > { %746 = vmatpush1.bf16.msra.mxu0 %v1805_v19  ;;  %787 = vmatpush1.bf16.msra.mxu1 %v1817_v23 }
 0x1a3   : > { %747 = vmatprep.subr.bf16.mxu0 %v1814_v22  ;;  %788 = vmatprep.subr.bf16.mxu1 %v1823_v25 }
 0x1a6   : > { %748 = vmatpush1.bf16.msra.mxu0 %v1821_v24  ;;  %789 = vmatpush1.bf16.msra.mxu1 %v1829_v27 }
 0x1a7   : > { %749 = vmatprep.subr.bf16.mxu0 %v1826_v26  ;;  %790 = vmatprep.subr.bf16.mxu1 %v1835_v29 }
 0x1aa   : > { %750 = vmatpush1.bf16.msra.mxu0 %v1833_v28  ;;  %791 = vmatpush1.bf16.msra.mxu1 %v1841_v31 }
 0x1ab   : > { %751 = vmatprep.subr.bf16.mxu0 %v1838_v30  ;;  %792 = vmatprep.subr.bf16.mxu1 %v1847_v34 }
 0x1ae   : > { %752 = vmatpush1.bf16.msra.mxu0 %v1845_v32  ;;  %793 = vmatpush1.bf16.msra.mxu1 %v1851_v36 }
 0x1af   : > { %847 = vmatprep.subr.bf16.mxu0 %v1758_v2  ;;  %888 = vmatprep.subr.bf16.mxu1 %v1768_v6  ;;  %v1138_v6 = vld [vmem:[%s1744_s6 + $0x38] sm:$0xff] }
 0x264   : > { %v661_v44 = vpop.f32.mrb[4].mxu0  ;;  %v702_v45 = vpop.f32.mrb[4].mxu1 }
 0x265   : > { %v709_v46 = vadd.f32 %v1135_v42, %v661_v44  ;;  %v663_v47 = vpop.f32.mrb[5].mxu0  ;;  %v704_v48 = vpop.f32.mrb[5].mxu1  ;;  %v711_v2 = vadd.f32 %v1137_v49, %v702_v45  ;;  %v1144_v49 = vld [vmem:[%s1744_s6 + $0x68] sm:$0xff] }
 0x266   : > { %v710_v50 = vadd.f32 %v1136_v43, %v663_v47  ;;  %v665_v51 = vpop.f32.mrb[6].mxu0  ;;  %v706_v52 = vpop.f32.mrb[6].mxu1  ;;  %v712_v57 = vadd.f32 %v1138_v6, %v704_v48  ;;  %v1143_v48 = vld [vmem:[%s1744_s6 + $0x60] sm:$0xff] }
 0x267   : > { %v713_v53 = vmul.f32 0.5, %v709_v46  ;;  %v666_v54 = vpop.f32.mrb[7].mxu0  ;;  %v707_v55 = vpop.f32.mrb[7].mxu1 }
 0x268   : > { %v717_v56 = vmul.f32 0.5, %v710_v50  ;;  %v722_v58 = vmul.f32 0.5, %v712_v57  ;;  %v1145_v55 = vld [vmem:[%s1744_s6 + $0x70] sm:$0xff] }
 0x269   : > { %1308 = vtanh.f32 %v713_v53 }
 0x26a   : > { %1310 = vtanh.f32 %v717_v56 }
 0x26b   : > { %1312 = vtanh.f32 %v711_v2 }
 0x26c   : > { %1314 = vtanh.f32 %v722_v58 }
 0x273   : > { %v1309_v59 = vpop.eup %1308 }
 0x274   : > { %v1311_v60 = vpop.eup %1310  ;;  %v715_v61 = vmul.f32 0.5, %v1309_v59 }
 0x275   : > { %v719_v62 = vmul.f32 0.5, %v1311_v60  ;;  %v1313_v0 = vpop.eup %1312 }
 0x276   : > { %v716_v63 = vadd.f32 0.5, %v715_v61  ;;  %v1315_v39 = vpop.eup %1314 }
 0x277   : > { %v720_v1 = vadd.f32 0.5, %v719_v62  ;;  %v724_v40 = vmul.f32 0.5, %v1315_v39  ;;  %v1146_v62 = vld [vmem:[%s1744_s6 + $0x78] sm:$0xff] }
 0x278   : > { %v727_v35 = vmul.f32 %v1313_v0, %v716_v63 }
 0x279   : > { %v726_v37 = vmul.f32 %v720_v1, %v1896_v33  ;;  %v725_v41 = vadd.f32 0.5, %v724_v40 }
 0x27b   : > { %v1938_v38 = vadd.f32 %v727_v35, %v726_v37 }
 0x27d   : > { %1316 = vtanh.f32 %v1938_v38 }
 0x287   : > { %v1317_v42 = vpop.eup %1316 }
 0x288   : > { %v730_v43 = vmul.f32 %v1317_v42, %v725_v41 }
 0x28a   : > { %v736_v44 = vpack.c.bf16 %v730_v43, %v730_v43 }
 0x28c   : > { %770 = vmatmul.mubr.bf16.vlgmr.msra.gmra.mrb[8].mxu0 %v736_v44  ;;  %811 = vmatmul.mubr.bf16.vlgmr.msra.gmra.mrb[8].mxu1 %v736_v44 }
 0x28d   : > { %848 = vmatpush1.bf16.msra.mxu0 %v1760_v3  ;;  %889 = vmatpush1.bf16.msra.mxu1 %v1772_v8  ;;  %v1139_v3 = vld [vmem:[%s1744_s6 + $0x40] sm:$0xff] }
 0x28e   : > { %849 = vmatprep.subr.bf16.mxu0 %v1765_v5  ;;  %890 = vmatprep.subr.bf16.mxu1 %v1778_v10 }
 0x28f   : > { %879 = vmatprep.mubr.bf16.mxu0 %v1547_v4  ;;  %920 = vmatprep.mubr.bf16.mxu1 %v1547_v4  ;;  %v1140_v4 = vld [vmem:[%s1744_s6 + $0x48] sm:$0xff] }
 0x291   : > { %850 = vmatpush1.bf16.msra.mxu0 %v1770_v7  ;;  %891 = vmatpush1.bf16.msra.mxu1 %v1781_v11  ;;  %v1141_v11 = vld [vmem:[%s1744_s6 + $0x50] sm:$0xff] }
 0x292   : > { %851 = vmatprep.subr.bf16.mxu0 %v1775_v9  ;;  %892 = vmatprep.subr.bf16.mxu1 %v1790_v14 }
 0x295   : > { %852 = vmatpush1.bf16.msra.mxu0 %v1785_v12  ;;  %893 = vmatpush1.bf16.msra.mxu1 %v1793_v15 }
 0x296   : > { %853 = vmatprep.subr.bf16.mxu0 %v1788_v13  ;;  %894 = vmatprep.subr.bf16.mxu1 %v1799_v17 }
 0x299   : > { %854 = vmatpush1.bf16.msra.mxu0 %v1797_v16  ;;  %895 = vmatpush1.bf16.msra.mxu1 %v1807_v20  ;;  %v1142_v20 = vld [vmem:[%s1744_s6 + $0x58] sm:$0xff] }
 0x29a   : > { %855 = vmatprep.subr.bf16.mxu0 %v1802_v18  ;;  %896 = vmatprep.subr.bf16.mxu1 %v1811_v21 }
 0x29d   : > { %856 = vmatpush1.bf16.msra.mxu0 %v1805_v19  ;;  %897 = vmatpush1.bf16.msra.mxu1 %v1817_v23 }
 0x29e   : > { %857 = vmatprep.subr.bf16.mxu0 %v1814_v22  ;;  %898 = vmatprep.subr.bf16.mxu1 %v1823_v25 }
 0x2a1   : > { %858 = vmatpush1.bf16.msra.mxu0 %v1821_v24  ;;  %899 = vmatpush1.bf16.msra.mxu1 %v1829_v27 }
 0x2a2   : > { %859 = vmatprep.subr.bf16.mxu0 %v1826_v26  ;;  %900 = vmatprep.subr.bf16.mxu1 %v1835_v29 }
 0x2a5   : > { %860 = vmatpush1.bf16.msra.mxu0 %v1833_v28  ;;  %901 = vmatpush1.bf16.msra.mxu1 %v1841_v31 }
 0x2a6   : > { %861 = vmatprep.subr.bf16.mxu0 %v1838_v30  ;;  %902 = vmatprep.subr.bf16.mxu1 %v1847_v34 }
 0x2a9   : > { %862 = vmatpush1.bf16.msra.mxu0 %v1845_v32  ;;  %903 = vmatpush1.bf16.msra.mxu1 %v1851_v36 }
 0x35f   : > { %v771_v5 = vpop.f32.mrb[8].mxu0  ;;  %v812_v7 = vpop.f32.mrb[8].mxu1 }
 0x360   : > { %v819_v8 = vadd.f32 %v1139_v3, %v771_v5  ;;  %v773_v9 = vpop.f32.mrb[9].mxu0  ;;  %v814_v10 = vpop.f32.mrb[9].mxu1  ;;  %v821_v19 = vadd.f32 %v1141_v11, %v812_v7 }
 0x361   : > { %v820_v12 = vadd.f32 %v1140_v4, %v773_v9  ;;  %v775_v13 = vpop.f32.mrb[10].mxu0  ;;  %v816_v14 = vpop.f32.mrb[10].mxu1  ;;  %v822_v21 = vadd.f32 %v1142_v20, %v814_v10 }
 0x362   : > { %v823_v15 = vmul.f32 0.5, %v819_v8  ;;  %v776_v16 = vpop.f32.mrb[11].mxu0  ;;  %v817_v17 = vpop.f32.mrb[11].mxu1 }
 0x363   : > { %v827_v18 = vmul.f32 0.5, %v820_v12  ;;  %v832_v22 = vmul.f32 0.5, %v822_v21 }
 0x364   : > { %1318 = vtanh.f32 %v823_v15 }
 0x365   : > { %1320 = vtanh.f32 %v827_v18 }
 0x366   : > { %1322 = vtanh.f32 %v821_v19 }
 0x367   : > { %1324 = vtanh.f32 %v832_v22 }
 0x36e   : > { %v1319_v23 = vpop.eup %1318 }
 0x36f   : > { %v1321_v24 = vpop.eup %1320  ;;  %v825_v25 = vmul.f32 0.5, %v1319_v23 }
 0x370   : > { %v829_v26 = vmul.f32 0.5, %v1321_v24  ;;  %v1323_v28 = vpop.eup %1322 }
 0x371   : > { %v826_v27 = vadd.f32 0.5, %v825_v25  ;;  %v1325_v34 = vpop.eup %1324 }
 0x372   : > { %v830_v29 = vadd.f32 0.5, %v829_v26  ;;  %v834_v36 = vmul.f32 0.5, %v1325_v34 }
 0x373   : > { %v837_v30 = vmul.f32 %v1323_v28, %v826_v27 }
 0x374   : > { %v836_v31 = vmul.f32 %v830_v29, %v1938_v38  ;;  %v835_v33 = vadd.f32 0.5, %v834_v36 }
 0x376   : > { %v838_v32 = vadd.f32 %v837_v30, %v836_v31 }
 0x378   : > { %1326 = vtanh.f32 %v838_v32 }
 0x382   : > { %v1327_v45 = vpop.eup %1326 }
 0x383   : > { %v840_v46 = vmul.f32 %v1327_v45, %v835_v33 }
 0x385   : > { %v846_v47 = vpack.c.bf16 %v840_v46, %v840_v46 }
 0x387   : > { %880 = vmatmul.mubr.bf16.vlgmr.msra.gmra.mrb[12].mxu0 %v846_v47  ;;  %921 = vmatmul.mubr.bf16.vlgmr.msra.gmra.mrb[12].mxu1 %v846_v47 }
 0x45a   : > { %v881_v50 = vpop.f32.mrb[12].mxu0  ;;  %v922_v51 = vpop.f32.mrb[12].mxu1 }
 0x45b   : > { %v929_v52 = vadd.f32 %v1143_v48, %v881_v50  ;;  %v883_v53 = vpop.f32.mrb[13].mxu0  ;;  %v924_v54 = vpop.f32.mrb[13].mxu1  ;;  %v931_v61 = vadd.f32 %v1145_v55, %v922_v51 }
 0x45c   : > { %v930_v56 = vadd.f32 %v1144_v49, %v883_v53  ;;  %v885_v2 = vpop.f32.mrb[14].mxu0  ;;  %v926_v6 = vpop.f32.mrb[14].mxu1  ;;  %v932_v63 = vadd.f32 %v1146_v62, %v924_v54 }
 0x45d   : > { %v933_v57 = vmul.f32 0.5, %v929_v52  ;;  %v886_v58 = vpop.f32.mrb[15].mxu0  ;;  %v927_v59 = vpop.f32.mrb[15].mxu1 }
 0x45e   : > { %v937_v60 = vmul.f32 0.5, %v930_v56  ;;  %v942_v0 = vmul.f32 0.5, %v932_v63 }
 0x45f   : > { %1328 = vtanh.f32 %v933_v57 }
 0x460   : > { %1330 = vtanh.f32 %v937_v60 }
 0x461   : > { %1332 = vtanh.f32 %v931_v61 }
 0x462   : > { %1334 = vtanh.f32 %v942_v0 }
 0x469   : > { %v1329_v1 = vpop.eup %1328 }
 0x46a   : > { %v1331_v35 = vpop.eup %1330  ;;  %v935_v37 = vmul.f32 0.5, %v1329_v1 }
 0x46b   : > { %v939_v38 = vmul.f32 0.5, %v1331_v35  ;;  %v1333_v40 = vpop.eup %1332 }
 0x46c   : > { %v936_v39 = vadd.f32 0.5, %v935_v37 }
 0x46d   : > { %v940_v41 = vadd.f32 0.5, %v939_v38 }
 0x46e   : > { %v947_v42 = vmul.f32 %v1333_v40, %v936_v39 }
 0x46f   : > { %v946_v43 = vmul.f32 %v940_v41, %v838_v32 }
 0x471   : > { %v948_v44 = vadd.f32 %v947_v42, %v946_v43 }
 0x473   : > { %1336 = vtanh.f32 %v948_v44  ;;  %952 = vst [vmem:[#allocation9] sm:$0xff] %v948_v44 }
 0x474   : > { %1437 = shalt.err (!%p1434_p13)
}
 0x475   : > { %s1438_s29 = scalar_lea.hbm %s2055_s5, 128 }
 0x476   : > { %p1439_p2 = scmp.ne.s32.totalorder %s2055_s5, %s1438_s29  ;;  %p1444_p0 = scmp.lt.u32.totalorder %s1438_s29, %s2055_s5 }
 0x478   : > { %p1440_p3 = pnand %p1439_p2, %p1984_p9 }
 0x47a   : > { %p1441_p12 = pneg %p1440_p3 }
 0x47c   : > { %p1446_p6 = pnand %p1444_p0, %p1441_p12 }
 0x47e   : > { %1449 = shalt.err (!%p1446_p6)
}
 0x47f   : > { %1168 = dma.vmem_to_hbm [thread:$0]  (%p1984_p9), %s976_s25, 128, %s2055_s5, [#allocation10]   ;;  %v1335_v3 = vpop.eup %1334 }
 0x480   : > { %v944_v4 = vmul.f32 0.5, %v1335_v3  ;;  %s1549_s17 = smov [#allocation8]   ;;  %v1337_v7 = vpop.eup %1336 }
 0x481   : > { %s962_s18 = sshll.u32 %s1549_s17, 4  ;;  %s963_s18 = int_to_ptr.vmem [resolvable:$true] %s962_s18 }
 0x482   : > { %v945_v5 = vadd.f32 0.5, %v944_v4  ;;  %s1450_s28 = scalar_lea.vmem %s963_s18, 128  ;;  %p1457_p4 = scmp.lt.s32.totalorder %s963_s18, %s963_s18 }
 0x483   : > { %p1451_p7 = scmp.ne.s32.totalorder %s963_s18, %s1450_s28  ;;  %p1458_p5 = scmp.lt.s32.totalorder %s1450_s28, %s1450_s28 }
 0x484   : > { %v950_v8 = vmul.f32 %v1337_v7, %v945_v5 }
 0x485   : > { %p1452_p8 = pnand %p1451_p7, %p1984_p9  ;;  %p1459_p10 = por %p1458_p5, %p1457_p4 }
 0x486   : > { %951 = vst [vmem:[#allocation8] sm:$0xff] %v950_v8 }
 0x487   : > { %p1453_p1 = pneg %p1452_p8 }
 0x489   : > { %p1460_p11 = pnand %p1459_p10, %p1453_p1 }
 0x48b   : > { %1463 = shalt.err (!%p1460_p11)
}
 0x48c   : > { %s1464_s10 = scalar_lea.hbm %s2054_s4, 128 }
 0x48d   : > { %p1465_p13 = scmp.ne.s32.totalorder %s2054_s4, %s1464_s10  ;;  %p1470_p12 = scmp.lt.u32.totalorder %s1464_s10, %s2054_s4 }
 0x48f   : > { %p1466_p2 = pnand %p1465_p13, %p1984_p9 }
 0x491   : > { %p1467_p3 = pneg %p1466_p2 }
 0x493   : > { %p1472_p0 = pnand %p1470_p12, %p1467_p3 }
 0x495   : > { %1475 = shalt.err (!%p1472_p0)
}
 0x496   : > { %1166 = dma.vmem_to_hbm [thread:$0]  (%p1984_p9), %s963_s18, 128, %s2054_s4, [#allocation4]  }
 0x497   : > { %1509 = dma.done.wait (%p1984_p9), [#allocation4], 128  }
 0x498   : > { %1511 = vsyncadd (%p1984_p9), [#allocation4], 4294967168 }
 0x499   : > { %1513 = dma.done.wait (%p1984_p9), [#allocation10], 128  }
 0x49a   : > { %1515 = vsyncadd (%p1984_p9), [#allocation10], 4294967168 }
 0x49b PF: > { %s22_s23 = sadd.s32 1, %s1538_s23   ;;  %s2069_s18 = smov %s1522_s19 }
 0x49c   : > { %p19_p6 = scmp.ge.s32.totalorder %s22_s23, 4   ;;  %s2070_s19 = smov %s1526_s20 }
 0x49d   : > { %s2071_s20 = smov %s1698_s8  ;;  %s2072_s21 = smov %s1534_s22 }
 0x49e   : > { %s2073_s22 = smov %s2075_s16  ;;  %21 = sbr.rel (!%p19_p6) target bundleno = 7 (0x7), region = 102 }
 0x4a5   :  { %992 = vsyncpa [#allocation3], 1 }
 0x4a6   :  { %994 = vsyncpa [#allocation3 + $0x1], 1 }
 0x4a7   :  { %995 = vsyncpa [#allocation6], 1 }
 0x4a8   :  { %996 = vsyncpa [#allocation4], 1 }
 0x4a9   :  { %998 = vsyncpa [#allocation4 + $0x1], 1 }
 0x4aa   :  { %999 = vsyncpa [#allocation10], 1 }

</bundles_post_ra>
